<compile_context>
chip_gen: v7x
topology: tpu7x:2x2x1
jax: 0.10.0
libtpu: 0.0.40
codegen_flags: <defaults>
</compile_context>

<pallas_src>
import functools
import math

import jax
import jax.numpy as jnp
from jax.experimental import pallas as pl
from jax.experimental.pallas import tpu as pltpu


# ---------------------------------------------------------------------------
# Kernel
# ---------------------------------------------------------------------------
def _layernorm_kernel(x_ref, w_ref, b_ref, o_ref, *, eps, seg):
    """LayerNorm over each packed segment of C = width // seg lanes.

    x_ref: (tm, W) with W = seg * C (lane-dense when seg > 1).
    w_ref, b_ref: (1, W) float32 (weight / bias tiled `seg` times by the wrapper).
    """
    x = x_ref[...].astype(jnp.float32)
    rows, width = x.shape
    c = width // seg
    inv_c = 1.0 / c

    if seg == 1:
        xs = x
    else:
        # Exact per-segment statistics: view the lane-dense block as
        # (tm, seg, C) and reduce over the trailing C channels of each packed
        # row.  The relayout is VMEM-local; the HBM DMAs and the store below
        # stay lane-dense.
        xs = x.reshape(rows, seg, c)

    # Two-pass statistics in f32 (exactly torch's mean / biased variance).
    mu = jnp.sum(xs, axis=-1, keepdims=True) * inv_c
    xc = xs - mu
    var = jnp.sum(xc * xc, axis=-1, keepdims=True) * inv_c
    xn = xc * jax.lax.rsqrt(var + eps)
    if seg > 1:
        xn = xn.reshape(rows, width)

    # f32 affine epilogue on every generation (v5e has no bf16 VALU; f32 also
    # matches torch's parameter application); cast only at the final store.
    o_ref[...] = (xn * w_ref[...] + b_ref[...]).astype(o_ref.dtype)


# ---------------------------------------------------------------------------
# Tiling / packing heuristics
# ---------------------------------------------------------------------------
def _default_scoped_vmem_bytes():
    """Default *scoped* VMEM limit (not physical): 16 MiB v5e, 32 MiB v6e/v7x.

    Unknown / older parts fall back to the conservative 16 MiB.
    """
    try:
        kind = jax.devices()[0].device_kind.lower()
    except Exception:
        kind = ""
    if "v6" in kind or "v7" in kind:
        return 32 << 20
    return 16 << 20


def _row_tile(m_rows, width, itemsize):
    """Rows per block, budgeted against the default scoped VMEM limit."""
    budget = (_default_scoped_vmem_bytes() * 3) // 4          # leave headroom
    # Resident bytes/row ~= 2x double-buffered input + 2x double-buffered
    # output (in the I/O dtype) + ~3 f32 temporaries inside the body.
    per_row = width * (4 * itemsize + 3 * 4)
    rows = max(8, budget // per_row)

    total_bytes = m_rows * width * itemsize
    if total_bytes > (4 << 20):
        # Large input: keep >= ~16 grid steps so the software pipeline (and
        # both TensorCores on v7x) have work.
        per_step = max(8, ((pl.cdiv(m_rows, 16) + 7) // 8) * 8)
        rows = min(rows, per_step)
    # Small input: take the biggest tile that fits (possibly the whole array);
    # forcing many tiny steps would just pay the ~0.35us per-step overhead.

    if rows >= m_rows:
        return m_rows
    return max(8, (rows // 8) * 8)                            # sublane-align


def _pack_factor(c, m_rows):
    """Rows packed per lane-dense row: k = lcm(C, 128) // C (1 = no packing)."""
    if c % 128 == 0:
        return 1
    k = math.lcm(c, 128) // c
    if k > 64 or m_rows < k:
        return 1                      # absurd packing factor or too few rows
    return k


# ---------------------------------------------------------------------------
# pallas_call wrapper
# ---------------------------------------------------------------------------
def _layernorm_call(x2, w_row, b_row, *, eps, seg, tm):
    m_rows, width = x2.shape
    if tm is None:
        tm = _row_tile(m_rows, width, x2.dtype.itemsize)
    return pl.pallas_call(
        functools.partial(_layernorm_kernel, eps=eps, seg=seg),
        out_shape=jax.ShapeDtypeStruct((m_rows, width), x2.dtype),
        grid_spec=pltpu.PrefetchScalarGridSpec(
            num_scalar_prefetch=0,
            grid=(pl.cdiv(m_rows, tm),),
            in_specs=[
                # If an xprof trace ever shows exposed DMA, add
                # pipeline_mode=pl.Buffered(3) here (measure first).
                pl.BlockSpec((tm, width), lambda i: (i, 0)),
                pl.BlockSpec((1, width), lambda i: (0, 0)),
                pl.BlockSpec((1, width), lambda i: (0, 0)),
            ],
            out_specs=pl.BlockSpec((tm, width), lambda i: (i, 0)),
        ),
        # TODO(synk): on v7x, pltpu.CORE_PARALLEL (or a core_map split) on the
        # row axis is what actually changes codegen for the dual-TensorCore
        # split; "parallel" is the portable default kept here.
        compiler_params=pltpu.CompilerParams(
            dimension_semantics=("parallel",),
        ),
    )(x2, w_row, b_row)


def with_bias_layernorm(x, weight, bias, *, eps=1e-5, tm=None, pack=True):
    """WithBias_LayerNorm forward. x: (..., C); weight, bias: (C,)."""
    orig_shape = x.shape
    c = orig_shape[-1]
    x2 = x.reshape(-1, c)
    m = x2.shape[0]

    w32 = weight.reshape(-1).astype(jnp.float32)
    b32 = bias.reshape(-1).astype(jnp.float32)

    seg = _pack_factor(c, m) if pack else 1
    if seg > 1:
        m_pad = pl.cdiv(m, seg) * seg
        xp = x2 if m_pad == m else jnp.pad(x2, ((0, m_pad - m), (0, 0)))
        # Contiguous row-major reshape -> free at the XLA level; padded rows
        # (if any) form their own segments and are sliced off below.
        xp = xp.reshape(m_pad // seg, seg * c)
        w_row = jnp.tile(w32, seg)[None, :]
        b_row = jnp.tile(b32, seg)[None, :]
        try:
            out = _layernorm_call(xp, w_row, b_row, eps=eps, seg=seg, tm=tm)
            return out.reshape(m_pad, c)[:m].reshape(orig_shape)
        except Exception:
            # Defensive: if this Mosaic build cannot lower the packed kernel's
            # minor-dim reshape, fall back to the (correct, unpacked) kernel.
            # The fallback triggers on eager calls; under jax.jit pass
            # pack=False instead if the packed variant is rejected.
            pass

    out = _layernorm_call(x2, w32[None, :], b32[None, :], eps=eps, seg=1, tm=tm)
    return out.reshape(orig_shape)


# ---------------------------------------------------------------------------
# Reference + self-test
# ---------------------------------------------------------------------------
def _reference(x, weight, bias, eps=1e-5):
    x = x.astype(jnp.float32)
    mu = jnp.mean(x, axis=-1, keepdims=True)
    var = jnp.mean((x - mu) ** 2, axis=-1, keepdims=True)
    return (x - mu) / jnp.sqrt(var + eps) * weight.astype(jnp.float32) \
        + bias.astype(jnp.float32)


if __name__ == "__main__":
    key = jax.random.PRNGKey(0)
    k1, k2, k3, k4, k5 = jax.random.split(key, 5)

    # 1) Module-default parameters (ones/zeros), small Restormer-like shape,
    #    C=32 -> packing factor 4 (packed lane width 128).
    B, N, C = 2, 8, 32
    x1 = jax.random.normal(k1, (B, N, C), dtype=jnp.float32)
    w1 = jnp.ones((C,), dtype=jnp.float32)
    b1 = jnp.zeros((C,), dtype=jnp.float32)
    y1 = jax.block_until_ready(with_bias_layernorm(x1, w1, b1))
    assert y1.shape == x1.shape
    assert jnp.allclose(y1, _reference(x1, w1, b1), atol=1e-5, rtol=1e-5), \
        "f32 mismatch vs reference (case 1, C=32 packed)"

    # 2) Restormer first-stage C=48 (packing factor 8, packed width 384),
    #    non-trivial affine params, row count NOT divisible by the packing
    #    factor (exercises the pad/slice tail), and off-center inputs
    #    (exercises the exact two-pass variance).
    B2, N2, C2 = 2, 301, 48
    x2 = 3.0 + jax.random.normal(k2, (B2, N2, C2), dtype=jnp.float32)
    w2 = 1.0 + 0.1 * jax.random.normal(k3, (C2,), dtype=jnp.float32)
    b2 = 0.1 * jax.random.normal(k4, (C2,), dtype=jnp.float32)
    y2 = jax.block_until_ready(with_bias_layernorm(x2, w2, b2))
    assert jnp.allclose(y2, _reference(x2, w2, b2), atol=1e-5, rtol=1e-5), \
        "f32 mismatch vs reference (case 2, C=48 packed + ragged tail)"

    # 3) bf16 activations: f32 statistics + f32 affine, bf16 store.
    x3 = x2.astype(jnp.bfloat16)
    y3 = jax.block_until_ready(with_bias_layernorm(x3, w2, b2))
    assert y3.dtype == jnp.bfloat16
    assert jnp.allclose(y3.astype(jnp.float32), _reference(x3, w2, b2),
                        atol=3e-2, rtol=3e-2), "bf16 mismatch vs reference (case 3)"

    # 4) C already a multiple of 128 -> unpacked kernel path (seg=1).
    B4, N4, C4 = 2, 12, 128
    x4 = jax.random.normal(k5, (B4, N4, C4), dtype=jnp.float32)
    w4 = jnp.ones((C4,), dtype=jnp.float32)
    b4 = jnp.zeros((C4,), dtype=jnp.float32)
    y4 = jax.block_until_ready(with_bias_layernorm(x4, w4, b4))
    assert jnp.allclose(y4, _reference(x4, w4, b4), atol=1e-5, rtol=1e-5), \
        "f32 mismatch vs reference (case 4, seg=1 unpacked)"

    print("KERNEL_OK")
</pallas_src>

<mosaic_0001>
module attributes {stable_mosaic.version = 11 : i64} {
  func.func @_layernorm_kernel(%arg0: i32, %arg1: memref<4x128xf32, #tpu.memory_space<vmem>>, %arg2: memref<1x128xf32, #tpu.memory_space<vmem>>, %arg3: memref<1x128xf32, #tpu.memory_space<vmem>>, %arg4: memref<4x128xf32, #tpu.memory_space<vmem>>) attributes {dimension_semantics = [#tpu.dimension_semantics<parallel>], iteration_bounds = array<i64: 1>, scalar_prefetch = 0 : i64, scratch_operands = 0 : i64, tpu.core_type = #tpu.core_type<tc>, window_params = [{transform_indices = @transform_0, window_bounds = array<i64: 4, 128>}, {pipeline_mode = #tpu.pipeline_mode<synchronous>, transform_indices = @transform_1, window_bounds = array<i64: 1, 128>}, {pipeline_mode = #tpu.pipeline_mode<synchronous>, transform_indices = @transform_2, window_bounds = array<i64: 1, 128>}, {transform_indices = @transform_3, window_bounds = array<i64: 4, 128>}]} {
    %c0 = arith.constant 0 : index
    %c0_0 = arith.constant 0 : index
    %0 = vector.load %arg1[%c0, %c0_0] : memref<4x128xf32, #tpu.memory_space<vmem>>, vector<4x128xf32>
    %1 = vector.shape_cast %0 : vector<4x128xf32> to vector<4x4x32xf32>
    %cst = arith.constant dense<0.000000e+00> : vector<4x4xf32>
    %2 = vector.multi_reduction <add>, %1, %cst [2] : vector<4x4x32xf32> to vector<4x4xf32>
    %3 = vector.shape_cast %2 : vector<4x4xf32> to vector<4x4x1xf32>
    %cst_1 = arith.constant 3.125000e-02 : f32
    %4 = vector.broadcast %cst_1 : f32 to vector<4x4x1xf32>
    %5 = arith.mulf %3, %4 : vector<4x4x1xf32>
    %6 = vector.broadcast %5 : vector<4x4x1xf32> to vector<4x4x32xf32>
    %7 = arith.subf %1, %6 : vector<4x4x32xf32>
    %8 = arith.mulf %7, %7 : vector<4x4x32xf32>
    %cst_2 = arith.constant dense<0.000000e+00> : vector<4x4xf32>
    %9 = vector.multi_reduction <add>, %8, %cst_2 [2] : vector<4x4x32xf32> to vector<4x4xf32>
    %10 = vector.shape_cast %9 : vector<4x4xf32> to vector<4x4x1xf32>
    %cst_3 = arith.constant 3.125000e-02 : f32
    %11 = vector.broadcast %cst_3 : f32 to vector<4x4x1xf32>
    %12 = arith.mulf %10, %11 : vector<4x4x1xf32>
    %cst_4 = arith.constant 9.99999974E-6 : f32
    %13 = vector.broadcast %cst_4 : f32 to vector<4x4x1xf32>
    %14 = arith.addf %12, %13 : vector<4x4x1xf32>
    %15 = math.rsqrt %14 : vector<4x4x1xf32>
    %16 = vector.broadcast %15 : vector<4x4x1xf32> to vector<4x4x32xf32>
    %17 = arith.mulf %7, %16 : vector<4x4x32xf32>
    %18 = vector.shape_cast %17 : vector<4x4x32xf32> to vector<4x128xf32>
    %c0_5 = arith.constant 0 : index
    %c0_6 = arith.constant 0 : index
    %19 = vector.load %arg2[%c0_5, %c0_6] : memref<1x128xf32, #tpu.memory_space<vmem>>, vector<1x128xf32>
    %20 = vector.broadcast %19 : vector<1x128xf32> to vector<4x128xf32>
    %21 = arith.mulf %18, %20 : vector<4x128xf32>
    %c0_7 = arith.constant 0 : index
    %c0_8 = arith.constant 0 : index
    %22 = vector.load %arg3[%c0_7, %c0_8] : memref<1x128xf32, #tpu.memory_space<vmem>>, vector<1x128xf32>
    %23 = vector.broadcast %22 : vector<1x128xf32> to vector<4x128xf32>
    %24 = arith.addf %21, %23 : vector<4x128xf32>
    %c0_9 = arith.constant 0 : index
    %c0_10 = arith.constant 0 : index
    %25 = vector.load %arg4[%c0_9, %c0_10] : memref<4x128xf32, #tpu.memory_space<vmem>>, vector<4x128xf32>
    tpu.vector_store %arg4[%c0_9, %c0_10], %24 {strides = array<i32>} : memref<4x128xf32, #tpu.memory_space<vmem>>, vector<4x128xf32>,
    return
  }
  func.func @transform_0(%arg0: i32) -> (i32, i32) {
    %c0_i32 = arith.constant 0 : i32
    %c0_i32_0 = arith.constant 0 : i32
    return %arg0, %c0_i32 : i32, i32
  }
  func.func @transform_1(%arg0: i32) -> (i32, i32) {
    %c0_i32 = arith.constant 0 : i32
    %c0_i32_0 = arith.constant 0 : i32
    %c0_i32_1 = arith.constant 0 : i32
    return %c0_i32, %c0_i32_0 : i32, i32
  }
  func.func @transform_2(%arg0: i32) -> (i32, i32) {
    %c0_i32 = arith.constant 0 : i32
    %c0_i32_0 = arith.constant 0 : i32
    %c0_i32_1 = arith.constant 0 : i32
    return %c0_i32, %c0_i32_0 : i32, i32
  }
  func.func @transform_3(%arg0: i32) -> (i32, i32) {
    %c0_i32 = arith.constant 0 : i32
    %c0_i32_0 = arith.constant 0 : i32
    return %arg0, %c0_i32 : i32, i32
  }
}

module attributes {stable_mosaic.version = 11 : i64} {
  func.func @_layernorm_kernel(%arg0: i32, %arg1: memref<16x32xf32, #tpu.memory_space<vmem>>, %arg2: memref<1x32xf32, #tpu.memory_space<vmem>>, %arg3: memref<1x32xf32, #tpu.memory_space<vmem>>, %arg4: memref<16x32xf32, #tpu.memory_space<vmem>>) attributes {dimension_semantics = [#tpu.dimension_semantics<parallel>], iteration_bounds = array<i64: 1>, scalar_prefetch = 0 : i64, scratch_operands = 0 : i64, tpu.core_type = #tpu.core_type<tc>, window_params = [{transform_indices = @transform_0, window_bounds = array<i64: 16, 32>}, {pipeline_mode = #tpu.pipeline_mode<synchronous>, transform_indices = @transform_1, window_bounds = array<i64: 1, 32>}, {pipeline_mode = #tpu.pipeline_mode<synchronous>, transform_indices = @transform_2, window_bounds = array<i64: 1, 32>}, {transform_indices = @transform_3, window_bounds = array<i64: 16, 32>}]} {
    %c0 = arith.constant 0 : index
    %c0_0 = arith.constant 0 : index
    %0 = vector.load %arg1[%c0, %c0_0] : memref<16x32xf32, #tpu.memory_space<vmem>>, vector<16x32xf32>
    %cst = arith.constant dense<0.000000e+00> : vector<16xf32>
    %1 = vector.multi_reduction <add>, %0, %cst [1] : vector<16x32xf32> to vector<16xf32>
    %2 = vector.shape_cast %1 : vector<16xf32> to vector<16x1xf32>
    %cst_1 = arith.constant 3.125000e-02 : f32
    %3 = vector.broadcast %cst_1 : f32 to vector<16x1xf32>
    %4 = arith.mulf %2, %3 : vector<16x1xf32>
    %5 = vector.broadcast %4 : vector<16x1xf32> to vector<16x32xf32>
    %6 = arith.subf %0, %5 : vector<16x32xf32>
    %7 = arith.mulf %6, %6 : vector<16x32xf32>
    %cst_2 = arith.constant dense<0.000000e+00> : vector<16xf32>
    %8 = vector.multi_reduction <add>, %7, %cst_2 [1] : vector<16x32xf32> to vector<16xf32>
    %9 = vector.shape_cast %8 : vector<16xf32> to vector<16x1xf32>
    %cst_3 = arith.constant 3.125000e-02 : f32
    %10 = vector.broadcast %cst_3 : f32 to vector<16x1xf32>
    %11 = arith.mulf %9, %10 : vector<16x1xf32>
    %cst_4 = arith.constant 9.99999974E-6 : f32
    %12 = vector.broadcast %cst_4 : f32 to vector<16x1xf32>
    %13 = arith.addf %11, %12 : vector<16x1xf32>
    %14 = math.rsqrt %13 : vector<16x1xf32>
    %15 = vector.broadcast %14 : vector<16x1xf32> to vector<16x32xf32>
    %16 = arith.mulf %6, %15 : vector<16x32xf32>
    %c0_5 = arith.constant 0 : index
    %c0_6 = arith.constant 0 : index
    %17 = vector.load %arg2[%c0_5, %c0_6] : memref<1x32xf32, #tpu.memory_space<vmem>>, vector<1x32xf32>
    %18 = vector.broadcast %17 : vector<1x32xf32> to vector<16x32xf32>
    %19 = arith.mulf %16, %18 : vector<16x32xf32>
    %c0_7 = arith.constant 0 : index
    %c0_8 = arith.constant 0 : index
    %20 = vector.load %arg3[%c0_7, %c0_8] : memref<1x32xf32, #tpu.memory_space<vmem>>, vector<1x32xf32>
    %21 = vector.broadcast %20 : vector<1x32xf32> to vector<16x32xf32>
    %22 = arith.addf %19, %21 : vector<16x32xf32>
    %c0_9 = arith.constant 0 : index
    %c0_10 = arith.constant 0 : index
    %23 = vector.load %arg4[%c0_9, %c0_10] : memref<16x32xf32, #tpu.memory_space<vmem>>, vector<16x32xf32>
    tpu.vector_store %arg4[%c0_9, %c0_10], %22 {strides = array<i32>} : memref<16x32xf32, #tpu.memory_space<vmem>>, vector<16x32xf32>,
    return
  }
  func.func @transform_0(%arg0: i32) -> (i32, i32) {
    %c0_i32 = arith.constant 0 : i32
    %c0_i32_0 = arith.constant 0 : i32
    return %arg0, %c0_i32 : i32, i32
  }
  func.func @transform_1(%arg0: i32) -> (i32, i32) {
    %c0_i32 = arith.constant 0 : i32
    %c0_i32_0 = arith.constant 0 : i32
    %c0_i32_1 = arith.constant 0 : i32
    return %c0_i32, %c0_i32_0 : i32, i32
  }
  func.func @transform_2(%arg0: i32) -> (i32, i32) {
    %c0_i32 = arith.constant 0 : i32
    %c0_i32_0 = arith.constant 0 : i32
    %c0_i32_1 = arith.constant 0 : i32
    return %c0_i32, %c0_i32_0 : i32, i32
  }
  func.func @transform_3(%arg0: i32) -> (i32, i32) {
    %c0_i32 = arith.constant 0 : i32
    %c0_i32_0 = arith.constant 0 : i32
    return %arg0, %c0_i32 : i32, i32
  }
}

</mosaic_0001>

<bundles_post_ra>
// kernel: tpu_custom_call.1
= control target key start
LH: loop header
LB: loop body
LE: loop exit
PB: predicated region body
PF: predicated region fallthrough
CT: control target
= control target key end

     0   :  { %8 = vsyncpa [#allocation3], 0  ;;  %s363_s0 = inlined_call_operand.hbm [shape: f32[4,128], index: 0, kind: input, shape index: {}]   ;;  %s364_s1 = inlined_call_operand.vmem [shape: f32[1,128], index: 1, kind: input, shape index: {}]   ;;  %s365_s2 = inlined_call_operand.vmem [shape: f32[1,128], index: 2, kind: input, shape index: {}]   ;;  %s366_s3 = inlined_call_operand.hbm [shape: f32[4,128], index: 3, kind: output, shape index: {}]  }
   0x1   :  { %9 = vsyncpa [#allocation4], 0  ;;  %s275_s12 = smov [#allocation2]   ;;  %s227_s16 = scalar_lea.hbm %s363_s0, 64 }
   0x2   :  { %s16_s13 = sshll.u32 %s275_s12, 4  ;;  %p228_p0 = scmp.ne.s32.totalorder %s363_s0, %s227_s16  ;;  %s17_s13 = int_to_ptr.vmem [resolvable:$true] %s16_s13 }
   0x3   :  { %p231_p1 = scmp.lt.u32.totalorder %s227_s16, %s363_s0 }
   0x5   :  { %p233_p2 = pnand %p231_p1, %p228_p0 }
   0x7   :  { %236 = shalt.err (!%p233_p2)
}
   0x8   :  { %s237_s21 = scalar_lea.vmem %s17_s13, 64  ;;  %p242_p4 = scmp.lt.s32.totalorder %s17_s13, %s17_s13 }
   0x9   :  { %p238_p3 = scmp.ne.s32.totalorder %s17_s13, %s237_s21  ;;  %p243_p5 = scmp.lt.s32.totalorder %s237_s21, %s237_s21 }
   0xb   :  { %p244_p6 = por %p243_p5, %p242_p4 }
   0xd   :  { %p245_p7 = pnand %p244_p6, %p238_p3 }
   0xf   :  { %248 = shalt.err (!%p245_p7)
}
  0x10   :  { %19 = dma.hbm_to_vmem [thread:$0]  %s363_s0, 64, %s17_s13, [#allocation3]  }
  0x11   :  { %271 = dma.done.wait [#allocation3], 64  }
  0x12   :  { %272 = vsyncadd [#allocation3], 4294967232  ;;  %v27_v0 = vld [vmem:[#allocation2] sm:$0xf]  ;;  %s276_s24 = smov 32   ;;  %s277_s25 = smov 96   ;;  %v42_v3 = vlaneseq }
  0x13   :  { %35 = vrot.lane.b32.xlu1 %v27_v0, %s276_s24  ;;  %29 = vrot.lane.b32.xlu0 %v27_v0, %s277_s25  ;;  %s278_s26 = smov 64   ;;  %v279_v1 = vmov 1983009808   ;;  %v280_v6 = vmov 1934713408   ;;  %vm72_vm0 = vcmask 257024  }
  0x14   :  { %v40_v2 = vunpack.c.l.s4 %v279_v1  ;;  %v43_v5 = vshrl.u32 %v42_v3, 7  ;;  %v57_v7 = vunpack.c.l.s4 %v280_v6  ;;  %v281_v23 = vmov 0.0   ;;  %s282_s30 = smov [#allocation5]  }
  0x15   :  { %vm171_vm1 = vcmask 261120   ;;  %vm173_vm2 = vcmask 523264   ;;  %vm175_vm3 = vcmask 785408   ;;  %s200_s4 = sshll.u32 %s282_s30, 4  ;;  %s201_s4 = int_to_ptr.vmem [resolvable:$true] %s200_s4 }
  0x16   :  { %v41_v4 = vunpack.c.0.s8 %v40_v2  ;;  %v58_v12 = vunpack.c.0.s8 %v57_v7  ;;  %s249_s5 = scalar_lea.vmem %s201_s4, 64  ;;  %p254_p9 = scmp.lt.s32.totalorder %s201_s4, %s201_s4 }
  0x17   :  { %32 = vrot.lane.b32.xlu0 %v27_v0, %s278_s26  ;;  %p250_p8 = scmp.ne.s32.totalorder %s201_s4, %s249_s5  ;;  %p255_p10 = scmp.lt.s32.totalorder %s249_s5, %s249_s5 }
  0x18   :  { %v318_v10 = vsub.s32 %v41_v4, %v43_v5  ;;  %v321_v16 = vsub.s32 %v58_v12, %v43_v5 }
  0x19   :  { %p256_p11 = por %p255_p10, %p254_p9 }
  0x1b   :  { %p257_p12 = pnand %p256_p11, %p250_p8 }
  0x85   :  { %v36_v8 = vpop.permute.xlu1 %35  ;;  %v30_v9 = vpop.permute.xlu0 %29 }
  0x86   :  { %v46_v11 = vcombine.low %v30_v9, %v36_v8 }
  0x88   :  { %v53_v15 = vrot.slane %v46_v11, %v318_v10 }
  0x89   :  { %v33_v13 = vpop.permute.xlu0 %32 }
  0x8a   :  { %v38_v14 = vcombine.low %v27_v0, %v33_v13 }
  0x8c   :  { %v45_v17 = vrot.slane %v38_v14, %v318_v10 }
  0x8e   :  { %v54_v18 = vcombine.low %v45_v17, %v53_v15  ;;  %v55_v19 = vcombine.high %v45_v17, %v53_v15 }
  0x90   :  { %v69_v20 = vrot.slane %v55_v19, %v321_v16  ;;  %v62_v21 = vrot.slane %v54_v18, %v321_v16 }
  0x92   :  { %v73_v22 = vsel %vm72_vm0, %v62_v21, 0.0  ;;  %v70_v24 = vcombine.high %v62_v21, %v281_v23  ;;  %v71_v25 = vcombine.high %v69_v20, %v281_v23  ;;  %v79_v28 = vsel %vm72_vm0, %v69_v20, 0.0 }
  0x93   :  { %74 = vadd.xlane.f32.xlu1 %v73_v22  ;;  %v210_v22 = vld [vmem:[%s365_s2] ss:$0 sm:$0xff] }
  0x94   :  { %v76_v26 = vsel %vm72_vm0, %v70_v24, 0.0  ;;  %v82_v27 = vsel %vm72_vm0, %v71_v25, 0.0 }
  0x95   :  { %77 = vadd.xlane.f32.xlu0 %v76_v26 }
  0x97   :  { %83 = vadd.xlane.f32.xlu1 %v82_v27 }
  0x99   :  { %80 = vadd.xlane.f32.xlu0 %v79_v28 }
 0x120   :  { %v75_v29 = vpop.xlane.xlu1 %74 }
 0x121   :  { %v85_v30 = vmul.f32 0.03125, %v75_v29 }
 0x122   :  { %v78_v31 = vpop.xlane.xlu0 %77 }
 0x123   :  { %v89_v32 = vsub.f32 %v62_v21, %v85_v30  ;;  %v86_v33 = vmul.f32 0.03125, %v78_v31 }
 0x124   :  { %v84_v34 = vpop.xlane.xlu1 %83 }
 0x125   :  { %v90_v35 = vsub.f32 %v70_v24, %v86_v33  ;;  %v88_v36 = vmul.f32 0.03125, %v84_v34  ;;  %v93_v37 = vmul.f32 %v89_v32, %v89_v32 }
 0x126   :  { %v81_v38 = vpop.xlane.xlu0 %80 }
 0x127   :  { %v92_v39 = vsub.f32 %v71_v25, %v88_v36  ;;  %v87_v40 = vmul.f32 0.03125, %v81_v38  ;;  %v97_v41 = vsel %vm72_vm0, %v93_v37, 0.0  ;;  %v94_v42 = vmul.f32 %v90_v35, %v90_v35 }
 0x128   :  { %98 = vadd.xlane.f32.xlu0 %v97_v41 }
 0x129   :  { %v91_v43 = vsub.f32 %v69_v20, %v87_v40  ;;  %v100_v44 = vsel %vm72_vm0, %v94_v42, 0.0  ;;  %v96_v45 = vmul.f32 %v92_v39, %v92_v39 }
 0x12a   :  { %101 = vadd.xlane.f32.xlu1 %v100_v44 }
 0x12b   :  { %v95_v46 = vmul.f32 %v91_v43, %v91_v43  ;;  %v106_v47 = vsel %vm72_vm0, %v96_v45, 0.0 }
 0x12d   :  { %v103_v48 = vsel %vm72_vm0, %v95_v46, 0.0 }
 0x12e   :  { %107 = vadd.xlane.f32.xlu1 %v106_v47  ;;  %104 = vadd.xlane.f32.xlu0 %v103_v48 }
 0x1b5   :  { %v99_v49 = vpop.xlane.xlu0 %98 }
 0x1b6   :  { %v109_v50 = vmul.f32 0.03125, %v99_v49 }
 0x1b7   :  { %v102_v51 = vpop.xlane.xlu1 %101 }
 0x1b8   :  { %v110_v52 = vmul.f32 0.03125, %v102_v51  ;;  %v113_v54 = vadd.f32 1e-05, %v109_v50 }
 0x1ba   :  { %v114_v53 = vadd.f32 1e-05, %v110_v52 }
 0x1bb   :  { %v108_v55 = vpop.xlane.xlu1 %107  ;;  %v105_v56 = vpop.xlane.xlu0 %104 }
 0x1bc   :  { %v112_v57 = vmul.f32 0.03125, %v108_v55  ;;  %v111_v58 = vmul.f32 0.03125, %v105_v56  ;;  %219 = vrsqrt.f32 %v114_v53 }
 0x1bd   :  { %221 = vrsqrt.f32 %v113_v54 }
 0x1be   :  { %v116_v59 = vadd.f32 1e-05, %v112_v57  ;;  %v115_v60 = vadd.f32 1e-05, %v111_v58 }
 0x1c0   :  { %223 = vrsqrt.f32 %v116_v59 }
 0x1c1   :  { %225 = vrsqrt.f32 %v115_v60 }
 0x1c6   :  { %v220_v61 = vpop.eup %219 }
 0x1c7   :  { %v222_v62 = vpop.eup %221  ;;  %v122_v1 = vmul.f32 %v220_v61, %v90_v35 }
 0x1c8   :  { %v121_v3 = vmul.f32 %v222_v62, %v89_v32 }
 0x1ca   :  { %v224_v63 = vpop.eup %223 }
 0x1cb   :  { %v226_v0 = vpop.eup %225  ;;  %v124_v2 = vmul.f32 %v224_v63, %v92_v39 }
 0x1cc   :  { %v123_v4 = vmul.f32 %v226_v0, %v91_v43 }
 0x1cd   :  { %v133_v5 = vcombine.low %v122_v1, %v124_v2 }
 0x1ce   :  { %v125_v6 = vcombine.low %v121_v3, %v123_v4 }
 0x1cf   :  { %v140_v7 = vrot.slane %v133_v5, %v318_v10 }
 0x1d0   :  { %v132_v8 = vrot.slane %v125_v6, %v318_v10 }
 0x1d2   :  { %v142_v9 = vcombine.high %v132_v8, %v140_v7  ;;  %v141_v11 = vcombine.low %v132_v8, %v140_v7 }
 0x1d4   :  { %v156_v12 = vrot.slane %v142_v9, %v321_v16  ;;  %v149_v13 = vrot.slane %v141_v11, %v321_v16  ;;  %v209_v16 = vld [vmem:[%s364_s1] ss:$0 sm:$0xff] }
 0x1d6   :  { %164 = vrot.lane.b32.xlu1 %v156_v12, %s278_s26  ;;  %v157_v14 = vcombine.high %v149_v13, %v281_v23  ;;  %v158_v15 = vcombine.high %v156_v12, %v281_v23 }
 0x1d8   :  { %160 = vrot.lane.b32.xlu0 %v157_v14, %s276_s24 }
 0x1da   :  { %168 = vrot.lane.b32.xlu1 %v158_v15, %s277_s25 }
 0x248   :  { %v165_v17 = vpop.permute.xlu1 %164 }
 0x24a   :  { %v161_v10 = vpop.permute.xlu0 %160 }
 0x24b   :  { %v172_v18 = vsel %vm171_vm1, %v149_v13, %v161_v10 }
 0x24c   :  { %v169_v19 = vpop.permute.xlu1 %168  ;;  %v174_v20 = vsel %vm173_vm2, %v172_v18, %v165_v17 }
 0x24d   :  { %v176_v21 = vsel %vm175_vm3, %v174_v20, %v169_v19 }
 0x24e   :  { %v184_v23 = vmul.f32 %v209_v16, %v176_v21 }
 0x250   :  { %v192_v24 = vadd.f32 %v210_v22, %v184_v23 }
 0x252   :  { %193 = vst [vmem:[#allocation5] sm:$0xf] %v192_v24 }
 0x253   :  { %260 = shalt.err (!%p257_p12)
}
 0x254   :  { %s261_s7 = scalar_lea.hbm %s366_s3, 64 }
 0x255   :  { %p262_p13 = scmp.ne.s32.totalorder %s366_s3, %s261_s7  ;;  %p265_p0 = scmp.lt.u32.totalorder %s261_s7, %s366_s3 }
 0x257   :  { %p267_p1 = pnand %p265_p0, %p262_p13 }
 0x259   :  { %270 = shalt.err (!%p267_p1)
}
 0x25a   :  { %203 = dma.vmem_to_hbm [thread:$0]  %s201_s4, 64, %s366_s3, [#allocation4]  }
 0x25b   :  { %273 = dma.done.wait [#allocation4], 64  }
 0x25c   :  { %274 = vsyncadd [#allocation4], 4294967232 }
 0x25d   :  { %207 = vsyncpa [#allocation3], 1 }
 0x25e   :  { %208 = vsyncpa [#allocation4], 1 }

// kernel: tpu_custom_call.1
= control target key start
LH: loop header
LB: loop body
LE: loop exit
PB: predicated region body
PF: predicated region fallthrough
CT: control target
= control target key end

     0   :  { %8 = vsyncpa [#allocation3], 0  ;;  %s219_s0 = inlined_call_operand.hbm [shape: f32[16,32], index: 0, kind: input, shape index: {}]   ;;  %s220_s1 = inlined_call_operand.vmem [shape: f32[1,32], index: 1, kind: input, shape index: {}]   ;;  %s221_s2 = inlined_call_operand.vmem [shape: f32[1,32], index: 2, kind: input, shape index: {}]   ;;  %s222_s3 = inlined_call_operand.hbm [shape: f32[16,32], index: 3, kind: output, shape index: {}]  }
   0x1   :  { %9 = vsyncpa [#allocation4], 0  ;;  %s153_s12 = smov [#allocation2]   ;;  %s105_s16 = scalar_lea.hbm %s219_s0, 256 }
   0x2   :  { %s15_s13 = sshll.u32 %s153_s12, 4  ;;  %p106_p0 = scmp.ne.s32.totalorder %s219_s0, %s105_s16  ;;  %s16_s13 = int_to_ptr.vmem [resolvable:$true] %s15_s13 }
   0x3   :  { %p109_p1 = scmp.lt.u32.totalorder %s105_s16, %s219_s0 }
   0x5   :  { %p111_p2 = pnand %p109_p1, %p106_p0 }
   0x7   :  { %114 = shalt.err (!%p111_p2)
}
   0x8   :  { %s115_s21 = scalar_lea.vmem %s16_s13, 256  ;;  %p120_p4 = scmp.lt.s32.totalorder %s16_s13, %s16_s13 }
   0x9   :  { %p116_p3 = scmp.ne.s32.totalorder %s16_s13, %s115_s21  ;;  %p121_p5 = scmp.lt.s32.totalorder %s115_s21, %s115_s21 }
   0xb   :  { %p122_p6 = por %p121_p5, %p120_p4 }
   0xd   :  { %p123_p7 = pnand %p122_p6, %p116_p3 }
   0xf   :  { %126 = shalt.err (!%p123_p7)
}
  0x10   :  { %s154_s22 = smov 128   ;;  %s155_s23 = smov 8  }
  0x11   :  { %21 = dma.hbm_to_vmem [thread:$0]  %s219_s0, 256, %s16_s13, [#allocation3], %s154_s22, %s154_s22, %s155_s23  }
  0x12   :  { %149 = dma.done.wait [#allocation3], 256  }
  0x13   :  { %150 = vsyncadd [#allocation3], 4294967040  ;;  %vm31_vm0 = vcmask 261120   ;;  %v29_v0 = vld [vmem:[#allocation2] sm:$0xff]  ;;  %v30_v1 = vld [vmem:[#allocation2 + $0x8] sm:$0xff]  ;;  %s156_s29 = smov [#allocation5]  }
  0x14   :  { %v32_v2 = vsel %vm31_vm0, %v29_v0, 0.0  ;;  %v35_v3 = vsel %vm31_vm0, %v30_v1, 0.0  ;;  %v95_v21 = vld [vmem:[%s220_s1] ss:$0 sm:$0xff]  ;;  %s83_s30 = sshll.u32 %s156_s29, 4  ;;  %s84_s30 = int_to_ptr.vmem [resolvable:$true] %s83_s30 }
  0x15   :  { %33 = vadd.xlane.f32.xlu0 %v32_v2  ;;  %v96_v23 = vld [vmem:[%s221_s2] ss:$0 sm:$0xff]  ;;  %s127_s4 = scalar_lea.vmem %s84_s30, 256  ;;  %p132_p9 = scmp.lt.s32.totalorder %s84_s30, %s84_s30 }
  0x16   :  { %p128_p8 = scmp.ne.s32.totalorder %s84_s30, %s127_s4  ;;  %p133_p10 = scmp.lt.s32.totalorder %s127_s4, %s127_s4 }
  0x18   :  { %p134_p11 = por %p133_p10, %p132_p9 }
  0x19   :  { %36 = vadd.xlane.f32.xlu0 %v35_v3 }
  0x1a   :  { %p135_p12 = pnand %p134_p11, %p128_p8 }
  0xa2   :  { %v34_v4 = vpop.xlane.xlu0 %33 }
  0xa3   :  { %v38_v5 = vmul.f32 0.03125, %v34_v4 }
  0xa5   :  { %v40_v6 = vsub.f32 %v29_v0, %v38_v5 }
  0xa6   :  { %v37_v7 = vpop.xlane.xlu0 %36 }
  0xa7   :  { %v39_v8 = vmul.f32 0.03125, %v37_v7  ;;  %v42_v9 = vmul.f32 %v40_v6, %v40_v6 }
  0xa9   :  { %v41_v10 = vsub.f32 %v30_v1, %v39_v8  ;;  %v44_v11 = vsel %vm31_vm0, %v42_v9, 0.0 }
  0xaa   :  { %45 = vadd.xlane.f32.xlu1 %v44_v11 }
  0xab   :  { %v43_v12 = vmul.f32 %v41_v10, %v41_v10 }
  0xad   :  { %v47_v13 = vsel %vm31_vm0, %v43_v12, 0.0 }
  0xae   :  { %48 = vadd.xlane.f32.xlu1 %v47_v13 }
 0x137   :  { %v46_v14 = vpop.xlane.xlu1 %45 }
 0x138   :  { %v50_v15 = vmul.f32 0.03125, %v46_v14 }
 0x13a   :  { %v52_v16 = vadd.f32 1e-05, %v50_v15 }
 0x13b   :  { %v49_v17 = vpop.xlane.xlu1 %48 }
 0x13c   :  { %101 = vrsqrt.f32 %v52_v16  ;;  %v51_v18 = vmul.f32 0.03125, %v49_v17 }
 0x13e   :  { %v53_v19 = vadd.f32 1e-05, %v51_v18 }
 0x140   :  { %103 = vrsqrt.f32 %v53_v19 }
 0x146   :  { %v102_v20 = vpop.eup %101 }
 0x147   :  { %v56_v22 = vmul.f32 %v102_v20, %v40_v6 }
 0x149   :  { %v65_v24 = vmul.f32 %v95_v21, %v56_v22 }
 0x14a   :  { %v104_v25 = vpop.eup %103 }
 0x14b   :  { %v57_v26 = vmul.f32 %v104_v25, %v41_v10  ;;  %v74_v27 = vadd.f32 %v96_v23, %v65_v24 }
 0x14d   :  { %v66_v28 = vmul.f32 %v95_v21, %v57_v26  ;;  %76 = vst.msk [vmem:[#allocation5] sm:$0xff] %vm31_vm0, %v74_v27 }
 0x14f   :  { %v75_v29 = vadd.f32 %v96_v23, %v66_v28 }
 0x151   :  { %77 = vst.msk [vmem:[#allocation5 + $0x8] sm:$0xff] %vm31_vm0, %v75_v29 }
 0x152   :  { %138 = shalt.err (!%p135_p12)
}
 0x153   :  { %s139_s5 = scalar_lea.hbm %s222_s3, 256 }
 0x154   :  { %p140_p13 = scmp.ne.s32.totalorder %s222_s3, %s139_s5  ;;  %p143_p0 = scmp.lt.u32.totalorder %s139_s5, %s222_s3 }
 0x156   :  { %p145_p1 = pnand %p143_p0, %p140_p13 }
 0x158   :  { %148 = shalt.err (!%p145_p1)
}
 0x159   :  { %89 = dma.vmem_to_hbm [thread:$0]  %s84_s30, 256, %s222_s3, [#allocation4], %s154_s22, %s154_s22, %s155_s23  }
 0x15a   :  { %151 = dma.done.wait [#allocation4], 256  }
 0x15b   :  { %152 = vsyncadd [#allocation4], 4294967040 }
 0x15c   :  { %93 = vsyncpa [#allocation3], 1 }
 0x15d   :  { %94 = vsyncpa [#allocation4], 1 }

</bundles_post_ra>
